<compile_context>
chip_gen: v5e
topology: v5e:2x2
jax: 0.10.0
libtpu: 0.0.40
codegen_flags: <defaults>
</compile_context>

<pallas_src>
import jax
import jax.numpy as jnp
from jax.experimental import pallas as pl
from jax.experimental.pallas import tpu as pltpu

LANE = 128


def _round_up(x, m):
    return (x + m - 1) // m * m


# ----------------------------------------------------------------------------
# Kernel: one GRU-cell step + decoder per grid iteration, weights resident.
# ----------------------------------------------------------------------------
def char_gru_seq_kernel(tok_ref,                       # SMEM (T, B) int32 (scalar prefetch)
                        emb_ref, h0_ref,               # VMEM (Vp, Hp), (B, Hp)
                        wih_ref, whh_ref,              # VMEM (Hp, 3*Hp)   gates [r|z|n]
                        bih_ref, bhh_ref,              # VMEM (1, 3*Hp)
                        wdec_ref, bdec_ref,            # VMEM (Hp, Op), (1, Op)
                        logits_ref, h_ref):            # out: (1, B, Op), (B, Hp) carry
    t = pl.program_id(0)
    B, Hp = h_ref.shape

    # Initialize the hidden-state carry once (output block is VMEM-resident
    # across the whole grid because its index_map is constant).
    @pl.when(t == 0)
    def _():
        h_ref[...] = h0_ref[...]

    # In-kernel embedding gather: B dynamic row slices from the resident table.
    rows = [emb_ref[pl.ds(tok_ref[t, b], 1), :] for b in range(B)]
    x = jnp.concatenate(rows, axis=0)                  # (B, Hp)

    h = h_ref[...]                                     # (B, Hp)

    # Input / hidden projections on the MXU, f32 accumulation.
    gi = jnp.dot(x, wih_ref[...], preferred_element_type=jnp.float32) + bih_ref[...]
    gh = jnp.dot(h, whh_ref[...], preferred_element_type=jnp.float32) + bhh_ref[...]

    # Gate segments are each Hp (=128) lanes wide -> slices are vreg-aligned.
    i_r, i_z, i_n = gi[:, 0:Hp], gi[:, Hp:2 * Hp], gi[:, 2 * Hp:3 * Hp]
    h_r, h_z, h_n = gh[:, 0:Hp], gh[:, Hp:2 * Hp], gh[:, 2 * Hp:3 * Hp]

    r = jax.nn.sigmoid(i_r + h_r)
    z = jax.nn.sigmoid(i_z + h_z)
    n = jnp.tanh(i_n + r * h_n)
    h_new = (1.0 - z) * n + z * h                      # padded cols stay 0

    h_ref[...] = h_new

    # Decoder: (B, Op) lane-dense store into this step's logits block.
    logits = jnp.dot(h_new, wdec_ref[...], preferred_element_type=jnp.float32) + bdec_ref[...]
    logits_ref[0] = logits.astype(logits_ref.dtype)


# ----------------------------------------------------------------------------
# Parameter construction (PyTorch-shaped) and lane-aligned packing.
# ----------------------------------------------------------------------------
def init_params(key, input_size, hidden_size, output_size):
    """Deterministic params mirroring CharRNN.__init__ shapes (PyTorch layout)."""
    H = hidden_size
    keys = jax.random.split(key, 7)
    lim = 1.0 / jnp.sqrt(jnp.float32(H))
    return {
        # nn.Embedding(input_size, H): N(0, 1)
        "embedding": jax.random.normal(keys[0], (input_size, H), jnp.float32),
        # nn.GRU(H, H, 1): weight_ih_l0 (3H,H), weight_hh_l0 (3H,H), biases (3H,)
        "w_ih": jax.random.uniform(keys[1], (3 * H, H), jnp.float32, -lim, lim),
        "w_hh": jax.random.uniform(keys[2], (3 * H, H), jnp.float32, -lim, lim),
        "b_ih": jax.random.uniform(keys[3], (3 * H,), jnp.float32, -lim, lim),
        "b_hh": jax.random.uniform(keys[4], (3 * H,), jnp.float32, -lim, lim),
        # nn.Linear(H, output_size): weight (O,H), bias (O,)
        "w_dec": jax.random.uniform(keys[5], (output_size, H), jnp.float32, -lim, lim),
        "b_dec": jax.random.uniform(keys[6], (output_size,), jnp.float32, -lim, lim),
    }


def pack_params(params):
    """Transpose + zero-pad weights so every kernel lane dim is a 128 multiple."""
    V, H = params["embedding"].shape
    O = params["w_dec"].shape[0]
    Hp = _round_up(H, LANE)
    Op = _round_up(O, LANE)
    Vp = _round_up(V, 8)

    def pad2(x, rows, cols):
        return jnp.pad(x, ((0, rows - x.shape[0]), (0, cols - x.shape[1])))

    def pad_gates_t(w):                       # (3H, H) -> (Hp, 3*Hp), gates lane-aligned
        wt = w.T                              # (H, 3H)
        out = jnp.zeros((Hp, 3 * Hp), jnp.float32)
        for g in range(3):
            out = out.at[:H, g * Hp:g * Hp + H].set(wt[:, g * H:(g + 1) * H])
        return out

    def pad_gate_bias(b):                     # (3H,) -> (1, 3*Hp)
        out = jnp.zeros((1, 3 * Hp), jnp.float32)
        for g in range(3):
            out = out.at[0, g * Hp:g * Hp + H].set(b[g * H:(g + 1) * H])
        return out

    return {
        "emb": pad2(params["embedding"], Vp, Hp),
        "w_ih_t": pad_gates_t(params["w_ih"]),
        "w_hh_t": pad_gates_t(params["w_hh"]),
        "b_ih": pad_gate_bias(params["b_ih"]),
        "b_hh": pad_gate_bias(params["b_hh"]),
        "w_dec_t": pad2(params["w_dec"].T, Hp, Op),
        "b_dec": pad2(params["b_dec"][None, :], 1, Op),
    }


# ----------------------------------------------------------------------------
# Fused-sequence forward (single pallas_call for T teacher-forced steps).
# ----------------------------------------------------------------------------
def char_rnn_forward_sequence(tokens, hidden, packed, hidden_size, output_size):
    """
    tokens: (T, B) int32 token ids (one CharRNN.forward step per row t)
    hidden: (1, B, H) float32 initial GRU hidden
    returns (logits (T, B, O), hidden' (1, B, H))
    """
    T, B = tokens.shape
    H, O = hidden_size, output_size
    Hp, Op = packed["w_dec_t"].shape

    h0 = jnp.zeros((B, Hp), jnp.float32).at[:, :H].set(hidden[0].astype(jnp.float32))

    def const_spec(shape):
        return pl.BlockSpec(shape, lambda t, tok: (0,) * len(shape))

    grid_spec = pltpu.PrefetchScalarGridSpec(
        num_scalar_prefetch=1,
        grid=(T,),
        in_specs=[
            const_spec(packed["emb"].shape),
            const_spec((B, Hp)),
            const_spec(packed["w_ih_t"].shape),
            const_spec(packed["w_hh_t"].shape),
            const_spec(packed["b_ih"].shape),
            const_spec(packed["b_hh"].shape),
            const_spec(packed["w_dec_t"].shape),
            const_spec(packed["b_dec"].shape),
        ],
        out_specs=(
            pl.BlockSpec((1, B, Op), lambda t, tok: (t, 0, 0)),   # per-step logits, lane-dense
            pl.BlockSpec((B, Hp), lambda t, tok: (0, 0)),         # resident hidden carry
        ),
    )

    logits_pad, h_pad = pl.pallas_call(
        char_gru_seq_kernel,
        grid_spec=grid_spec,
        out_shape=(
            jax.ShapeDtypeStruct((T, B, Op), jnp.float32),
            jax.ShapeDtypeStruct((B, Hp), jnp.float32),
        ),
        compiler_params=pltpu.CompilerParams(
            dimension_semantics=("arbitrary",)),   # sequential carry over time
    )(
        tokens.astype(jnp.int32),
        packed["emb"], h0,
        packed["w_ih_t"], packed["w_hh_t"], packed["b_ih"], packed["b_hh"],
        packed["w_dec_t"], packed["b_dec"],
    )

    return logits_pad[:, :, :O], h_pad[None, :, :H]


def char_rnn_forward(tokens, hidden, packed, hidden_size, output_size):
    """Exact single-step equivalent of CharRNN.forward(input, hidden)."""
    logits, h_new = char_rnn_forward_sequence(
        tokens[None, :], hidden, packed, hidden_size, output_size)
    return logits[0], h_new


# ----------------------------------------------------------------------------
# Pure-JAX reference (unpadded math, PyTorch GRU gate order r|z|n).
# ----------------------------------------------------------------------------
def reference_forward_sequence(tokens, hidden, params):
    H = params["w_hh"].shape[1]
    h = hidden[0]
    outs = []
    for t in range(tokens.shape[0]):
        x = jnp.take(params["embedding"], tokens[t], axis=0)
        gi = x @ params["w_ih"].T + params["b_ih"]
        gh = h @ params["w_hh"].T + params["b_hh"]
        r = jax.nn.sigmoid(gi[:, :H] + gh[:, :H])
        z = jax.nn.sigmoid(gi[:, H:2 * H] + gh[:, H:2 * H])
        n = jnp.tanh(gi[:, 2 * H:] + r * gh[:, 2 * H:])
        h = (1.0 - z) * n + z * h
        outs.append(h @ params["w_dec"].T + params["b_dec"])
    return jnp.stack(outs, axis=0), h[None]


if __name__ == "__main__":
    # Small shapes consistent with the module: vocab=64, hidden=32, batch=8, T=8.
    input_size = 64      # vocab
    hidden_size = 32
    output_size = 64     # vocab
    batch = 8
    seq_len = 8

    key = jax.random.PRNGKey(0)
    k_params, k_tokens = jax.random.split(key)
    params = init_params(k_params, input_size, hidden_size, output_size)
    packed = pack_params(params)

    tokens = jax.random.randint(k_tokens, (seq_len, batch), 0, input_size, dtype=jnp.int32)
    hidden = jnp.zeros((1, batch, hidden_size), jnp.float32)   # init_hidden for GRU

    # Fused T-step forward (one pallas_call for the whole sequence).
    logits, h_new = char_rnn_forward_sequence(tokens, hidden, packed,
                                              hidden_size, output_size)
    logits = jax.block_until_ready(logits)
    h_new = jax.block_until_ready(h_new)

    ref_logits, ref_h = reference_forward_sequence(tokens, hidden, params)
    assert logits.shape == (seq_len, batch, output_size)
    assert h_new.shape == (1, batch, hidden_size)
    assert jnp.allclose(logits, ref_logits, atol=1e-4, rtol=1e-4)
    assert jnp.allclose(h_new, ref_h, atol=1e-4, rtol=1e-4)

    # Single-step path == module's forward(input, hidden) semantics.
    step_logits, step_h = char_rnn_forward(tokens[0], hidden, packed,
                                           hidden_size, output_size)
    step_logits = jax.block_until_ready(step_logits)
    assert jnp.allclose(step_logits, ref_logits[0], atol=1e-4, rtol=1e-4)

    print("KERNEL_OK")
</pallas_src>

<mosaic_0001>
module attributes {stable_mosaic.version = 11 : i64} {
  func.func @char_gru_seq_kernel(%arg0: i32, %arg1: memref<8x8xi32, #tpu.memory_space<smem>>, %arg2: memref<64x128xf32, #tpu.memory_space<vmem>>, %arg3: memref<8x128xf32, #tpu.memory_space<vmem>>, %arg4: memref<128x384xf32, #tpu.memory_space<vmem>>, %arg5: memref<128x384xf32, #tpu.memory_space<vmem>>, %arg6: memref<1x384xf32, #tpu.memory_space<vmem>>, %arg7: memref<1x384xf32, #tpu.memory_space<vmem>>, %arg8: memref<128x128xf32, #tpu.memory_space<vmem>>, %arg9: memref<1x128xf32, #tpu.memory_space<vmem>>, %arg10: memref<1x8x128xf32, #tpu.memory_space<vmem>>, %arg11: memref<8x128xf32, #tpu.memory_space<vmem>>) attributes {dimension_semantics = [#tpu.dimension_semantics<arbitrary>], iteration_bounds = array<i64: 8>, scalar_prefetch = 1 : i64, scratch_operands = 0 : i64, tpu.core_type = #tpu.core_type<tc>, window_params = [{pipeline_mode = #tpu.pipeline_mode<synchronous>, transform_indices = @transform_0, window_bounds = array<i64: 64, 128>}, {pipeline_mode = #tpu.pipeline_mode<synchronous>, transform_indices = @transform_1, window_bounds = array<i64: 8, 128>}, {pipeline_mode = #tpu.pipeline_mode<synchronous>, transform_indices = @transform_2, window_bounds = array<i64: 128, 384>}, {pipeline_mode = #tpu.pipeline_mode<synchronous>, transform_indices = @transform_3, window_bounds = array<i64: 128, 384>}, {pipeline_mode = #tpu.pipeline_mode<synchronous>, transform_indices = @transform_4, window_bounds = array<i64: 1, 384>}, {pipeline_mode = #tpu.pipeline_mode<synchronous>, transform_indices = @transform_5, window_bounds = array<i64: 1, 384>}, {pipeline_mode = #tpu.pipeline_mode<synchronous>, transform_indices = @transform_6, window_bounds = array<i64: 128, 128>}, {pipeline_mode = #tpu.pipeline_mode<synchronous>, transform_indices = @transform_7, window_bounds = array<i64: 1, 128>}, {transform_indices = @transform_8, window_bounds = array<i64: 1, 8, 128>}, {pipeline_mode = #tpu.pipeline_mode<synchronous>, transform_indices = @transform_9, window_bounds = array<i64: 8, 128>}]} {
    %c0_i32 = arith.constant 0 : i32
    %0 = arith.cmpi eq, %arg0, %c0_i32 : i32
    %1 = arith.extui %0 : i1 to i32
    %c0_i32_0 = arith.constant 0 : i32
    %2 = arith.cmpi ne, %1, %c0_i32_0 : i32
    scf.if %2 {
      %c0_33 = arith.constant 0 : index
      %c0_34 = arith.constant 0 : index
      %82 = vector.load %arg3[%c0_33, %c0_34] : memref<8x128xf32, #tpu.memory_space<vmem>>, vector<8x128xf32>
      %c0_35 = arith.constant 0 : index
      %c0_36 = arith.constant 0 : index
      %83 = vector.load %arg11[%c0_35, %c0_36] : memref<8x128xf32, #tpu.memory_space<vmem>>, vector<8x128xf32>
      tpu.vector_store %arg11[%c0_35, %c0_36], %82 {strides = array<i32>} : memref<8x128xf32, #tpu.memory_space<vmem>>, vector<8x128xf32>,
    } else {
    }
    %3 = arith.index_cast %arg0 : i32 to index
    %c0 = arith.constant 0 : index
    %4 = memref.load %arg1[%3, %c0] : memref<8x8xi32, #tpu.memory_space<smem>>
    %5 = arith.index_cast %4 : i32 to index
    %c0_1 = arith.constant 0 : index
    %6 = vector.load %arg2[%5, %c0_1] : memref<64x128xf32, #tpu.memory_space<vmem>>, vector<1x128xf32>
    %7 = arith.index_cast %arg0 : i32 to index
    %c1 = arith.constant 1 : index
    %8 = memref.load %arg1[%7, %c1] : memref<8x8xi32, #tpu.memory_space<smem>>
    %9 = arith.index_cast %8 : i32 to index
    %c0_2 = arith.constant 0 : index
    %10 = vector.load %arg2[%9, %c0_2] : memref<64x128xf32, #tpu.memory_space<vmem>>, vector<1x128xf32>
    %11 = arith.index_cast %arg0 : i32 to index
    %c2 = arith.constant 2 : index
    %12 = memref.load %arg1[%11, %c2] : memref<8x8xi32, #tpu.memory_space<smem>>
    %13 = arith.index_cast %12 : i32 to index
    %c0_3 = arith.constant 0 : index
    %14 = vector.load %arg2[%13, %c0_3] : memref<64x128xf32, #tpu.memory_space<vmem>>, vector<1x128xf32>
    %15 = arith.index_cast %arg0 : i32 to index
    %c3 = arith.constant 3 : index
    %16 = memref.load %arg1[%15, %c3] : memref<8x8xi32, #tpu.memory_space<smem>>
    %17 = arith.index_cast %16 : i32 to index
    %c0_4 = arith.constant 0 : index
    %18 = vector.load %arg2[%17, %c0_4] : memref<64x128xf32, #tpu.memory_space<vmem>>, vector<1x128xf32>
    %19 = arith.index_cast %arg0 : i32 to index
    %c4 = arith.constant 4 : index
    %20 = memref.load %arg1[%19, %c4] : memref<8x8xi32, #tpu.memory_space<smem>>
    %21 = arith.index_cast %20 : i32 to index
    %c0_5 = arith.constant 0 : index
    %22 = vector.load %arg2[%21, %c0_5] : memref<64x128xf32, #tpu.memory_space<vmem>>, vector<1x128xf32>
    %23 = arith.index_cast %arg0 : i32 to index
    %c5 = arith.constant 5 : index
    %24 = memref.load %arg1[%23, %c5] : memref<8x8xi32, #tpu.memory_space<smem>>
    %25 = arith.index_cast %24 : i32 to index
    %c0_6 = arith.constant 0 : index
    %26 = vector.load %arg2[%25, %c0_6] : memref<64x128xf32, #tpu.memory_space<vmem>>, vector<1x128xf32>
    %27 = arith.index_cast %arg0 : i32 to index
    %c6 = arith.constant 6 : index
    %28 = memref.load %arg1[%27, %c6] : memref<8x8xi32, #tpu.memory_space<smem>>
    %29 = arith.index_cast %28 : i32 to index
    %c0_7 = arith.constant 0 : index
    %30 = vector.load %arg2[%29, %c0_7] : memref<64x128xf32, #tpu.memory_space<vmem>>, vector<1x128xf32>
    %31 = arith.index_cast %arg0 : i32 to index
    %c7 = arith.constant 7 : index
    %32 = memref.load %arg1[%31, %c7] : memref<8x8xi32, #tpu.memory_space<smem>>
    %33 = arith.index_cast %32 : i32 to index
    %c0_8 = arith.constant 0 : index
    %34 = vector.load %arg2[%33, %c0_8] : memref<64x128xf32, #tpu.memory_space<vmem>>, vector<1x128xf32>
    %35 = tpu.concatenate %6, %10, %14, %18, %22, %26, %30, %34 in 0 : vector<1x128xf32>, vector<1x128xf32>, vector<1x128xf32>, vector<1x128xf32>, vector<1x128xf32>, vector<1x128xf32>, vector<1x128xf32>, vector<1x128xf32> -> vector<8x128xf32>
    %c0_9 = arith.constant 0 : index
    %c0_10 = arith.constant 0 : index
    %36 = vector.load %arg11[%c0_9, %c0_10] : memref<8x128xf32, #tpu.memory_space<vmem>>, vector<8x128xf32>
    %c0_11 = arith.constant 0 : index
    %c0_12 = arith.constant 0 : index
    %37 = vector.load %arg4[%c0_11, %c0_12] : memref<128x384xf32, #tpu.memory_space<vmem>>, vector<128x384xf32>
    %cst = arith.constant dense<0.000000e+00> : vector<8x384xf32>
    %38 = tpu.matmul %35, %37, %cst {dimension_numbers = #tpu.dot_dimension_numbers<[1], [0], [0], [1], [0, 0, 1, 1], [], []>} : vector<8x128xf32>, vector<128x384xf32>, vector<8x384xf32> -> vector<8x384xf32>
    %c0_13 = arith.constant 0 : index
    %c0_14 = arith.constant 0 : index
    %39 = vector.load %arg6[%c0_13, %c0_14] : memref<1x384xf32, #tpu.memory_space<vmem>>, vector<1x384xf32>
    %40 = vector.broadcast %39 : vector<1x384xf32> to vector<8x384xf32>
    %41 = arith.addf %38, %40 : vector<8x384xf32>
    %c0_15 = arith.constant 0 : index
    %c0_16 = arith.constant 0 : index
    %42 = vector.load %arg5[%c0_15, %c0_16] : memref<128x384xf32, #tpu.memory_space<vmem>>, vector<128x384xf32>
    %cst_17 = arith.constant dense<0.000000e+00> : vector<8x384xf32>
    %43 = tpu.matmul %36, %42, %cst_17 {dimension_numbers = #tpu.dot_dimension_numbers<[1], [0], [0], [1], [0, 0, 1, 1], [], []>} : vector<8x128xf32>, vector<128x384xf32>, vector<8x384xf32> -> vector<8x384xf32>
    %c0_18 = arith.constant 0 : index
    %c0_19 = arith.constant 0 : index
    %44 = vector.load %arg7[%c0_18, %c0_19] : memref<1x384xf32, #tpu.memory_space<vmem>>, vector<1x384xf32>
    %45 = vector.broadcast %44 : vector<1x384xf32> to vector<8x384xf32>
    %46 = arith.addf %43, %45 : vector<8x384xf32>
    %47 = vector.extract_strided_slice %41 {offsets = [0, 0], sizes = [8, 128], strides = [1, 1]} : vector<8x384xf32> to vector<8x128xf32>
    %48 = vector.extract_strided_slice %41 {offsets = [0, 128], sizes = [8, 128], strides = [1, 1]} : vector<8x384xf32> to vector<8x128xf32>
    %49 = vector.extract_strided_slice %41 {offsets = [0, 256], sizes = [8, 128], strides = [1, 1]} : vector<8x384xf32> to vector<8x128xf32>
    %50 = vector.extract_strided_slice %46 {offsets = [0, 0], sizes = [8, 128], strides = [1, 1]} : vector<8x384xf32> to vector<8x128xf32>
    %51 = vector.extract_strided_slice %46 {offsets = [0, 128], sizes = [8, 128], strides = [1, 1]} : vector<8x384xf32> to vector<8x128xf32>
    %52 = vector.extract_strided_slice %46 {offsets = [0, 256], sizes = [8, 128], strides = [1, 1]} : vector<8x384xf32> to vector<8x128xf32>
    %53 = arith.addf %47, %50 : vector<8x128xf32>
    %54 = arith.negf %53 : vector<8x128xf32>
    %55 = math.exp %54 : vector<8x128xf32>
    %cst_20 = arith.constant 1.000000e+00 : f32
    %56 = vector.broadcast %cst_20 : f32 to vector<8x128xf32>
    %57 = arith.addf %56, %55 : vector<8x128xf32>
    %58 = arith.divf %56, %57 : vector<8x128xf32>
    %59 = arith.addf %48, %51 : vector<8x128xf32>
    %60 = arith.negf %59 : vector<8x128xf32>
    %61 = math.exp %60 : vector<8x128xf32>
    %cst_21 = arith.constant 1.000000e+00 : f32
    %62 = vector.broadcast %cst_21 : f32 to vector<8x128xf32>
    %63 = arith.addf %62, %61 : vector<8x128xf32>
    %64 = arith.divf %62, %63 : vector<8x128xf32>
    %65 = arith.mulf %58, %52 : vector<8x128xf32>
    %66 = arith.addf %49, %65 : vector<8x128xf32>
    %67 = math.tanh %66 : vector<8x128xf32>
    %cst_22 = arith.constant 1.000000e+00 : f32
    %68 = vector.broadcast %cst_22 : f32 to vector<8x128xf32>
    %69 = arith.subf %68, %64 : vector<8x128xf32>
    %70 = arith.mulf %69, %67 : vector<8x128xf32>
    %71 = arith.mulf %64, %36 : vector<8x128xf32>
    %72 = arith.addf %70, %71 : vector<8x128xf32>
    %c0_23 = arith.constant 0 : index
    %c0_24 = arith.constant 0 : index
    %73 = vector.load %arg11[%c0_23, %c0_24] : memref<8x128xf32, #tpu.memory_space<vmem>>, vector<8x128xf32>
    tpu.vector_store %arg11[%c0_23, %c0_24], %72 {strides = array<i32>} : memref<8x128xf32, #tpu.memory_space<vmem>>, vector<8x128xf32>,
    %c0_25 = arith.constant 0 : index
    %c0_26 = arith.constant 0 : index
    %74 = vector.load %arg8[%c0_25, %c0_26] : memref<128x128xf32, #tpu.memory_space<vmem>>, vector<128x128xf32>
    %cst_27 = arith.constant dense<0.000000e+00> : vector<8x128xf32>
    %75 = tpu.matmul %72, %74, %cst_27 {dimension_numbers = #tpu.dot_dimension_numbers<[1], [0], [0], [1], [0, 0, 1, 1], [], []>} : vector<8x128xf32>, vector<128x128xf32>, vector<8x128xf32> -> vector<8x128xf32>
    %c0_28 = arith.constant 0 : index
    %c0_29 = arith.constant 0 : index
    %76 = vector.load %arg9[%c0_28, %c0_29] : memref<1x128xf32, #tpu.memory_space<vmem>>, vector<1x128xf32>
    %77 = vector.broadcast %76 : vector<1x128xf32> to vector<8x128xf32>
    %78 = arith.addf %75, %77 : vector<8x128xf32>
    %c0_30 = arith.constant 0 : index
    %c0_31 = arith.constant 0 : index
    %c0_32 = arith.constant 0 : index
    %79 = vector.load %arg10[%c0_30, %c0_31, %c0_32] : memref<1x8x128xf32, #tpu.memory_space<vmem>>, vector<1x8x128xf32>
    %80 = vector.shape_cast %79 : vector<1x8x128xf32> to vector<8x128xf32>
    %81 = vector.shape_cast %78 : vector<8x128xf32> to vector<1x8x128xf32>
    tpu.vector_store %arg10[%c0_30, %c0_31, %c0_32], %81 {strides = array<i32>} : memref<1x8x128xf32, #tpu.memory_space<vmem>>, vector<1x8x128xf32>,
    return
  }
  func.func @transform_0(%arg0: i32, %arg1: memref<8x8xi32, #tpu.memory_space<smem>>) -> (i32, i32) {
    %c0_i32 = arith.constant 0 : i32
    %c0_i32_0 = arith.constant 0 : i32
    %c0_i32_1 = arith.constant 0 : i32
    return %c0_i32, %c0_i32_0 : i32, i32
  }
  func.func @transform_1(%arg0: i32, %arg1: memref<8x8xi32, #tpu.memory_space<smem>>) -> (i32, i32) {
    %c0_i32 = arith.constant 0 : i32
    %c0_i32_0 = arith.constant 0 : i32
    %c0_i32_1 = arith.constant 0 : i32
    return %c0_i32, %c0_i32_0 : i32, i32
  }
  func.func @transform_2(%arg0: i32, %arg1: memref<8x8xi32, #tpu.memory_space<smem>>) -> (i32, i32) {
    %c0_i32 = arith.constant 0 : i32
    %c0_i32_0 = arith.constant 0 : i32
    %c0_i32_1 = arith.constant 0 : i32
    return %c0_i32, %c0_i32_0 : i32, i32
  }
  func.func @transform_3(%arg0: i32, %arg1: memref<8x8xi32, #tpu.memory_space<smem>>) -> (i32, i32) {
    %c0_i32 = arith.constant 0 : i32
    %c0_i32_0 = arith.constant 0 : i32
    %c0_i32_1 = arith.constant 0 : i32
    return %c0_i32, %c0_i32_0 : i32, i32
  }
  func.func @transform_4(%arg0: i32, %arg1: memref<8x8xi32, #tpu.memory_space<smem>>) -> (i32, i32) {
    %c0_i32 = arith.constant 0 : i32
    %c0_i32_0 = arith.constant 0 : i32
    %c0_i32_1 = arith.constant 0 : i32
    return %c0_i32, %c0_i32_0 : i32, i32
  }
  func.func @transform_5(%arg0: i32, %arg1: memref<8x8xi32, #tpu.memory_space<smem>>) -> (i32, i32) {
    %c0_i32 = arith.constant 0 : i32
    %c0_i32_0 = arith.constant 0 : i32
    %c0_i32_1 = arith.constant 0 : i32
    return %c0_i32, %c0_i32_0 : i32, i32
  }
  func.func @transform_6(%arg0: i32, %arg1: memref<8x8xi32, #tpu.memory_space<smem>>) -> (i32, i32) {
    %c0_i32 = arith.constant 0 : i32
    %c0_i32_0 = arith.constant 0 : i32
    %c0_i32_1 = arith.constant 0 : i32
    return %c0_i32, %c0_i32_0 : i32, i32
  }
  func.func @transform_7(%arg0: i32, %arg1: memref<8x8xi32, #tpu.memory_space<smem>>) -> (i32, i32) {
    %c0_i32 = arith.constant 0 : i32
    %c0_i32_0 = arith.constant 0 : i32
    %c0_i32_1 = arith.constant 0 : i32
    return %c0_i32, %c0_i32_0 : i32, i32
  }
  func.func @transform_8(%arg0: i32, %arg1: memref<8x8xi32, #tpu.memory_space<smem>>) -> (i32, i32, i32) {
    %c0_i32 = arith.constant 0 : i32
    %c0_i32_0 = arith.constant 0 : i32
    %c0_i32_1 = arith.constant 0 : i32
    return %arg0, %c0_i32, %c0_i32_0 : i32, i32, i32
  }
  func.func @transform_9(%arg0: i32, %arg1: memref<8x8xi32, #tpu.memory_space<smem>>) -> (i32, i32) {
    %c0_i32 = arith.constant 0 : i32
    %c0_i32_0 = arith.constant 0 : i32
    %c0_i32_1 = arith.constant 0 : i32
    return %c0_i32, %c0_i32_0 : i32, i32
  }
}

</mosaic_0001>

<bundles_post_ra>
// kernel: tpu_custom_call.1
= control target key start
LH: loop header
LB: loop body
LE: loop exit
PB: predicated region body
PF: predicated region fallthrough
CT: control target
= control target key end

     0   :  { %s1420_s16 = smov [#allocation3]   ;;  %s1724_s0 = inlined_call_operand.hbm [shape: s32[8,8], index: 0, kind: input, shape index: {}]   ;;  %s1725_s1 = inlined_call_operand.hbm [shape: f32[64,128], index: 1, kind: input, shape index: {}]   ;;  %s1726_s2 = inlined_call_operand.hbm [shape: f32[8,128], index: 2, kind: input, shape index: {}]   ;;  %s1727_s3 = inlined_call_operand.hbm [shape: f32[128,384], index: 3, kind: input, shape index: {}]   ;;  %s1728_s4 = inlined_call_operand.hbm [shape: f32[128,384], index: 4, kind: input, shape index: {}]   ;;  %s1729_s5 = inlined_call_operand.vmem [shape: f32[1,384], index: 5, kind: input, shape index: {}]   ;;  %s1730_s6 = inlined_call_operand.hbm [shape: f32[1,384], index: 6, kind: input, shape index: {}]   ;;  %s1731_s7 = inlined_call_operand.hbm [shape: f32[128,128], index: 7, kind: input, shape index: {}]   ;;  %s1732_s8 = inlined_call_operand.vmem [shape: f32[1,128], index: 8, kind: input, shape index: {}]   ;;  %s1733_s9 = inlined_call_operand.hbm [shape: f32[8,8,128], index: 9, kind: output, shape index: {0}]   ;;  %s1734_s10 = inlined_call_operand.hbm [shape: f32[8,128], index: 10, kind: output, shape index: {1}]  }
   0x1   :  { %1738 = sst [smem:[#allocation28_spill]] %s1725_s1  ;;  %s17_s15 = sshll.u32 %s1724_s0, 4  ;;  %s18_s15 = int_to_ptr.hbm [resolvable:$true] %s17_s15 }
   0x2   :  { %1739 = sst [smem:[#allocation29_spill]] %s1726_s2 }
   0x3   :  { %1740 = sst [smem:[#allocation30_spill]] %s1727_s3 }
   0x4   :  { %1741 = sst [smem:[#allocation31_spill]] %s1728_s4 }
   0x5   :  { %20 = dma.hbm_to_smem %s18_s15, 128, %s1420_s16, [#allocation2] }
   0x6   :  { %1378 = dma.done.wait [#allocation2], 128 }
   0x7   :  { %1379 = vsyncadd [#allocation2], 4294967168 }
   0x8   :  { %23 = sfence }
   0x9   :  { %24 = vsyncpa [#allocation5], 0 }
   0xa   :  { %25 = vsyncpa [#allocation8], 0 }
   0xb   :  { %26 = vsyncpa [#allocation11], 0 }
   0xc   :  { %27 = vsyncpa [#allocation14], 0 }
   0xd   :  { %28 = vsyncpa [#allocation6], 0 }
   0xe   :  { %30 = vsyncpa [#allocation6 + $0x1], 0 }
   0xf   :  { %31 = vsyncpa [#allocation17], 0  ;;  %s1490_s17 = smov 0   ;;  %s1492_s18 = smov 0  }
  0x10   :  { %s1494_s19 = smov 0   ;;  %s1496_s0 = smov 0  }
  0x11 LB: > { %1742 = sst [smem:[#allocation25_spill]] %s1414_s19  ;;  %s1511_s20 = sadd.s32 4294967295, %s1418_s0   ;;  %s1418_s0 = sphi %s1496_s0, %s1753_s0   ;;  %s1414_s19 = sphi %s1494_s19, %s1755_s19   ;;  %s1410_s18 = sphi %s1492_s18, %s1757_s18   ;;  %s1406_s17 = sphi %s1490_s17, %s1756_s17  }
  0x12   : > { %s965_s21 = sadd.s32 4294967294, %s1418_s0   ;;  %s1515_s22 = sadd.s32 1, %s1418_s0  }
  0x13   : > { %1743 = sst [smem:[#allocation26_spill]] %s1515_s22  ;;  %s212_s23 = sadd.s32 1, %s1414_s19 }
  0x14   : > { %s209_s24 = ssub.s32 %s1418_s0, %s1515_s22  ;;  %p222_p0 = scmp.ne.s32.totalorder %s1414_s19, %s1410_s18 }
  0x15   : > { %p210_p1 = scmp.eq.s32.totalorder %s209_s24, 0  ;;  %p223_p2 = scmp.eq.s32.totalorder %s1511_s20, 7 }
  0x16   : > { %p228_p3 = scmp.ne.s32.totalorder %s1410_s18, %s1406_s17  ;;  %p229_p4 = scmp.eq.s32.totalorder %s965_s21, 7 }
  0x17   : > { %s1526_s25 = scalar_select %p210_p1, %s1414_s19, %s212_s23  }
  0x18   : > { %p1530_p5 = por %p223_p2, %p222_p0  ;;  %p1534_p6 = por %p229_p4, %p228_p3 }
  0x19   : > { %1744 = sst [smem:[#allocation27_spill]] %s1526_s25  ;;  %p966_p7 = scmp.ge.s32.totalorder %s1418_s0, 1 }
  0x1a   : > { %p257_p8 = scmp.lt.s32.totalorder %s1418_s0, 9  ;;  %p967_p9 = scmp.ne.s32.totalorder %s1511_s20, 0 }
  0x1b   : > { %p1044_p10 = scmp.eq.s32.totalorder %s1511_s20, 0  ;;  %s1748_s2 = sld [smem:[#allocation29_spill]] }
  0x1c   : > { %p1542_p11 = pnand %p966_p7, %p257_p8  ;;  %s1421_s12 = smov [#allocation7]  }
  0x1d   : > { %s285_s13 = sshll.u32 %s1421_s12, 4  ;;  %s1750_s4 = sld [smem:[#allocation31_spill]]  ;;  %s286_s13 = int_to_ptr.vmem [resolvable:$true] %s285_s13 }
  0x1e   : > { %p1021_p12 = pneg %p1542_p11  ;;  %s1422_s23 = smov [#allocation10]  }
  0x1f   : > { %s310_s24 = sshll.u32 %s1422_s23, 4  ;;  %s1751_s1 = sld [smem:[#allocation28_spill]]  ;;  %s311_s24 = int_to_ptr.vmem [resolvable:$true] %s310_s24 }
  0x20   : > { %p1553_p13 = pnand %p1044_p10, %p1021_p12  ;;  %s1424_s25 = smov 24  }
  0x21   : > { %s283_s11 = sshll.u32 %s1748_s2, 4  ;;  %s1423_s2 = smov 384   ;;  %s284_s11 = int_to_ptr.hbm [resolvable:$true] %s283_s11 }
  0x22   : > { %1027 = dma.hbm_to_vmem [thread:$0]  (!%p1553_p13), %s284_s11, 128, %s286_s13, [#allocation8]  }
  0x23   : > { %s308_s21 = sshll.u32 %s1750_s4, 4  ;;  %s1425_s15 = smov [#allocation4]   ;;  %s309_s21 = int_to_ptr.hbm [resolvable:$true] %s308_s21 }
  0x24   : > { %1033 = dma.hbm_to_vmem [thread:$0]  (!%p1553_p13), %s309_s21, 6144, %s311_s24, [#allocation11], %s1423_s2, %s1423_s2, %s1424_s25  }
  0x25   : > { %s268_s12 = sshll.u32 %s1751_s1, 4  ;;  %s270_s16 = sshll.u32 %s1425_s15, 4  ;;  %s269_s12 = int_to_ptr.hbm [resolvable:$true] %s268_s12  ;;  %s271_s16 = int_to_ptr.vmem [resolvable:$true] %s270_s16 }
  0x26   : > { %s1752_s3 = sld [smem:[#allocation30_spill]]  ;;  %s1426_s13 = smov 128  }
  0x27   : > { %s1427_s23 = smov 8   ;;  %s1428_s29 = smov [#allocation9]  }
  0x28   : > { %1024 = dma.hbm_to_vmem [thread:$0]  (!%p1553_p13), %s269_s12, 1024, %s271_s16, [#allocation5], %s1426_s13, %s1426_s13, %s1427_s23  }
  0x29   : > { %s296_s30 = sshll.u32 %s1428_s29, 4  ;;  %s326_s21 = sshll.u32 %s1730_s6, 4  ;;  %s297_s30 = int_to_ptr.vmem [resolvable:$true] %s296_s30  ;;  %s327_s21 = int_to_ptr.hbm [resolvable:$true] %s326_s21 }
  0x2a   : > { %s337_s19 = sshll.u32 %s1731_s7, 4  ;;  %s1429_s15 = smov [#allocation12]   ;;  %s338_s19 = int_to_ptr.hbm [resolvable:$true] %s337_s19 }
  0x2b   : > { %s1430_s12 = smov [#allocation13]  }
  0x2c   : > { %s294_s11 = sshll.u32 %s1752_s3, 4  ;;  %s328_s3 = sshll.u32 %s1429_s15, 4  ;;  %s295_s11 = int_to_ptr.hbm [resolvable:$true] %s294_s11  ;;  %s329_s3 = int_to_ptr.vmem [resolvable:$true] %s328_s3 }
  0x2d   : > { %1030 = dma.hbm_to_vmem [thread:$0]  (!%p1553_p13), %s295_s11, 6144, %s297_s30, [#allocation8], %s1423_s2, %s1423_s2, %s1424_s25  }
  0x2e   : > { %1036 = dma.hbm_to_vmem [thread:$0]  (!%p1553_p13), %s327_s21, 48, %s329_s3, [#allocation11]  }
  0x2f   : > { %s339_s16 = sshll.u32 %s1430_s12, 4  ;;  %358 = sbr.rel (%p1542_p11) target bundleno = 433 (0x1b1), region = 52  ;;  %s340_s16 = int_to_ptr.vmem [resolvable:$true] %s339_s16 }
  0x30   : > { %1039 = dma.hbm_to_vmem [thread:$0]  (!%p1553_p13), %s338_s19, 2048, %s340_s16, [#allocation14], %s1426_s13, %s1426_s13, %s1427_s23  }
  0x34   : > { %1381 = dma.done.wait (%p1044_p10), [#allocation5], 1024  }
  0x35   : > { %1383 = vsyncadd (%p1044_p10), [#allocation5], 4294966272 }
  0x36   : > { %1385 = dma.done.wait (%p1044_p10), [#allocation8], 6272  }
  0x37   : > { %1387 = vsyncadd (%p1044_p10), [#allocation8], 4294961024 }
  0x38   : > { %1389 = dma.done.wait (%p1044_p10), [#allocation11], 6192  }
  0x39   : > { %1391 = vsyncadd (%p1044_p10), [#allocation11], 4294961104 }
  0x3a   : > { %1393 = dma.done.wait (%p1044_p10), [#allocation14], 2048  }
  0x3b   : > { %1395 = vsyncadd (%p1044_p10), [#allocation14], 4294965248  ;;  %s410_s1 = sand.u32 1, %s1410_s18   ;;  %418 = sbr.rel (%p967_p9) target bundleno = 66 (0x42), region = 80 }
  0x3c   : > { %s1605_s2 = sshll.u32 %s410_s1, 3 }
  0x3d   : > { %s412_s3 = scalar_lea.vmem [#allocation15], %s1605_s2 }
  0x40   : > { %v419_v0 = vld [vmem:[#allocation7] sm:$0xff] }
  0x41   : > { %420 = vst [vmem:[#allocation16] sm:$0xff] %v419_v0 }
  0x42 PF: > { %v534_v1 = vld [vmem:[#allocation9 + $0x168] sm:$0xff]  ;;  %v531_v2 = vld [vmem:[#allocation9 + $0x150] sm:$0xff]  ;;  %s1611_s22 = sshll.u32 %s1511_s20, 7  ;;  %v528_v5 = vld [vmem:[#allocation9 + $0x138] sm:$0xff]  ;;  %vm474_vm0 = vcmask 1040384   ;;  %vm476_vm1 = vcmask 1041408  }
  0x43   : > { %v650_v3 = vld [vmem:[#allocation10 + $0x168] sm:$0xff]  ;;  %545 = vmatpush.msra.mxu0 %v534_v1  ;;  %v647_v4 = vld [vmem:[#allocation10 + $0x150] sm:$0xff]  ;;  %v644_v6 = vld [vmem:[#allocation10 + $0x138] sm:$0xff]  ;;  %s425_s25 = sadd.s32 1, %s1611_s22  ;;  %s429_s28 = sadd.s32 2, %s1611_s22  ;;  %vm478_vm2 = vcmask 1042432  }
  0x44   : > { %661 = vmatpush.msra.mxu3 %v650_v3  ;;  %v535_v7 = vld [vmem:[#allocation9 + $0x170] sm:$0xff]  ;;  %v532_v8 = vld [vmem:[#allocation9 + $0x158] sm:$0xff]  ;;  %v525_v9 = vld [vmem:[#allocation9 + $0x120] sm:$0xff]  ;;  %s1616_s14 = sld [smem:[#allocation3 + %s1611_s22]]  ;;  %s433_s11 = sadd.s32 3, %s1611_s22  ;;  %vm480_vm3 = vcmask 1043456  }
  0x45   : > { %546 = vmatpush.msra.mxu0 %v531_v2  ;;  %565 = vmatpush.msra.mxu1 %v535_v7  ;;  %v641_v10 = vld [vmem:[#allocation10 + $0x120] sm:$0xff]  ;;  %s1619_s13 = sld [smem:[#allocation3 + %s425_s25]]  ;;  %s437_s23 = sadd.s32 4, %s1611_s22  ;;  %v522_v12 = vld [vmem:[#allocation9 + $0x108] sm:$0xff]  ;;  %v519_v15 = vld [vmem:[#allocation9 + $0xf0] sm:$0xff]  ;;  %vm482_vm4 = vcmask 1044480  }
  0x46   : > { %662 = vmatpush.msra.mxu3 %v647_v4  ;;  %v529_v11 = vld [vmem:[#allocation9 + $0x140] sm:$0xff]  ;;  %v638_v13 = vld [vmem:[#allocation10 + $0x108] sm:$0xff]  ;;  %s1622_s29 = sld [smem:[#allocation3 + %s429_s28]]  ;;  %s441_s30 = sadd.s32 5, %s1611_s22  ;;  %v635_v16 = vld [vmem:[#allocation10 + $0xf0] sm:$0xff]  ;;  %vm484_vm5 = vcmask 1045504  }
  0x47   : > { %547 = vmatpush.msra.mxu0 %v528_v5  ;;  %566 = vmatpush.msra.mxu1 %v532_v8  ;;  %v526_v14 = vld [vmem:[#allocation9 + $0x128] sm:$0xff]  ;;  %s1625_s21 = sld [smem:[#allocation3 + %s433_s11]]  ;;  %s445_s24 = sadd.s32 6, %s1611_s22  ;;  %v523_v17 = vld [vmem:[#allocation9 + $0x110] sm:$0xff]  ;;  %v516_v18 = vld [vmem:[#allocation9 + $0xd8] sm:$0xff]  ;;  %vm486_vm6 = vcmask 1046528  }
  0x48   : > { %663 = vmatpush.msra.mxu3 %v644_v6  ;;  %s1628_s4 = sld [smem:[#allocation3 + %s437_s23]]  ;;  %s449_s19 = sadd.s32 7, %s1611_s22  ;;  %v632_v19 = vld [vmem:[#allocation10 + $0xd8] sm:$0xff]  ;;  %v513_v21 = vld [vmem:[#allocation9 + $0xc0] sm:$0xff]  ;;  %v510_v24 = vld [vmem:[#allocation9 + $0xa8] sm:$0xff] }
  0x49   : > { %548 = vmatpush.msra.mxu0 %v525_v9  ;;  %567 = vmatpush.msra.mxu1 %v529_v11  ;;  %s1631_s15 = sld [smem:[#allocation3 + %s441_s30]]  ;;  %v520_v20 = vld [vmem:[#allocation9 + $0xf8] sm:$0xff]  ;;  %v629_v22 = vld [vmem:[#allocation10 + $0xc0] sm:$0xff]  ;;  %v626_v25 = vld [vmem:[#allocation10 + $0xa8] sm:$0xff] }
  0x4a   : > { %664 = vmatpush.msra.mxu3 %v641_v10  ;;  %s1633_s12 = sld [smem:[#allocation3 + %s445_s24]]  ;;  %v517_v23 = vld [vmem:[#allocation9 + $0xe0] sm:$0xff]  ;;  %v514_v26 = vld [vmem:[#allocation9 + $0xc8] sm:$0xff]  ;;  %v507_v27 = vld [vmem:[#allocation9 + $0x90] sm:$0xff]  ;;  %s423_s23 = scalar_lea.vmem [#allocation4], %s1616_s14 }
  0x4b   : > { %549 = vmatpush.msra.mxu0 %v522_v12  ;;  %568 = vmatpush.msra.mxu1 %v526_v14  ;;  %s1635_s16 = sld [smem:[#allocation3 + %s449_s19]]  ;;  %v623_v28 = vld [vmem:[#allocation10 + $0x90] sm:$0xff]  ;;  %v536_v29 = vld [vmem:[#allocation9 + $0x178] sm:$0xff]  ;;  %v533_v32 = vld [vmem:[#allocation9 + $0x160] sm:$0xff]  ;;  %s427_s22 = scalar_lea.vmem [#allocation4], %s1619_s13 }
  0x4c   : > { %665 = vmatpush.msra.mxu3 %v638_v13  ;;  %v504_v30 = vld [vmem:[#allocation9 + $0x78] sm:$0xff]  ;;  %v511_v31 = vld [vmem:[#allocation9 + $0xb0] sm:$0xff]  ;;  %v501_v33 = vld [vmem:[#allocation9 + $0x60] sm:$0xff]  ;;  %585 = vmatpush.msra.mxu2 %v536_v29  ;;  %s431_s25 = scalar_lea.vmem [#allocation4], %s1622_s29  ;;  %s1431_s24 = smov [#allocation16]  }
  0x4d   : > { %550 = vmatpush.msra.mxu0 %v519_v15  ;;  %569 = vmatpush.msra.mxu1 %v523_v17  ;;  %v620_v34 = vld [vmem:[#allocation10 + $0x78] sm:$0xff]  ;;  %v617_v35 = vld [vmem:[#allocation10 + $0x60] sm:$0xff]  ;;  %v530_v37 = vld [vmem:[#allocation9 + $0x148] sm:$0xff]  ;;  %s435_s28 = scalar_lea.vmem [#allocation4], %s1625_s21  ;;  %s1354_s19 = scalar_lea.hbm %s1733_s9, 64 }
  0x4e   : > { %666 = vmatpush.msra.mxu3 %v635_v16  ;;  %v508_v36 = vld [vmem:[#allocation9 + $0x98] sm:$0xff]  ;;  %v498_v39 = vld [vmem:[#allocation9 + $0x48] sm:$0xff]  ;;  %586 = vmatpush.msra.mxu2 %v533_v32  ;;  %s439_s11 = scalar_lea.vmem [#allocation4], %s1628_s4  ;;  %v505_v44 = vld [vmem:[#allocation9 + $0x80] sm:$0xff]  ;;  %s835_s4 = sshll.u32 %s1431_s24, 4  ;;  %s836_s4 = int_to_ptr.vmem [resolvable:$true] %s835_s4 }
  0x4f   : > { %551 = vmatpush.msra.mxu0 %v516_v18  ;;  %570 = vmatpush.msra.mxu1 %v520_v20  ;;  %v428_v38 = vld [vmem:[%s427_s22] sm:$0x1]  ;;  %v614_v40 = vld [vmem:[#allocation10 + $0x48] sm:$0xff]  ;;  %s443_s13 = scalar_lea.vmem [#allocation4], %s1631_s15  ;;  %v527_v51 = vld [vmem:[#allocation9 + $0x130] sm:$0xff] }
  0x50   : > { %667 = vmatpush.msra.mxu3 %v632_v19  ;;  %v432_v41 = vld [vmem:[%s431_s25] sm:$0x1]  ;;  %587 = vmatpush.msra.mxu2 %v530_v37  ;;  %s447_s30 = scalar_lea.vmem [#allocation4], %s1633_s12  ;;  %v454_v48 = vrot.slane %v428_v38, 7  ;;  %v502_v52 = vld [vmem:[#allocation9 + $0x68] sm:$0xff]  ;;  %v495_v56 = vld [vmem:[#allocation9 + $0x30] sm:$0xff] }
  0x51   : > { %552 = vmatpush.msra.mxu0 %v513_v21  ;;  %571 = vmatpush.msra.mxu1 %v517_v23  ;;  %v436_v42 = vld [vmem:[%s435_s28] sm:$0x1]  ;;  %v457_v49 = vrot.slane %v432_v41, 6  ;;  %s451_s29 = scalar_lea.vmem [#allocation4], %s1635_s16  ;;  %v611_v57 = vld [vmem:[#allocation10 + $0x30] sm:$0xff]  ;;  %v521_v63 = vld [vmem:[#allocation9 + $0x100] sm:$0xff] }
  0x52   : > { %668 = vmatpush.msra.mxu3 %v629_v22  ;;  %v440_v43 = vld [vmem:[%s439_s11] sm:$0x1]  ;;  %v460_v50 = vrot.slane %v436_v42, 5  ;;  %588 = vmatpush.msra.mxu2 %v527_v51  ;;  %v499_v60 = vld [vmem:[#allocation9 + $0x50] sm:$0xff]  ;;  %v518_v6 = vld [vmem:[#allocation9 + $0xe8] sm:$0xff]  ;;  %s837_s12 = sshll.u32 %s1734_s10, 4  ;;  %s838_s12 = int_to_ptr.hbm [resolvable:$true] %s837_s12 }
  0x53   : > { %553 = vmatpush.msra.mxu0 %v510_v24  ;;  %572 = vmatpush.msra.mxu1 %v514_v26  ;;  %v424_v45 = vld [vmem:[%s423_s23] sm:$0x1]  ;;  %v463_v54 = vrot.slane %v440_v43, 4  ;;  %v489_v7 = vld [vmem:[#allocation9] sm:$0xff]  ;;  %v651_v10 = vld [vmem:[#allocation10 + $0x170] sm:$0xff]  ;;  %s986_s16 = sshll.u32 %s1511_s20, 3 }
  0x54   : > { %669 = vmatpush.msra.mxu3 %v626_v25  ;;  %v444_v46 = vld [vmem:[%s443_s13] sm:$0x1]  ;;  %v475_v59 = vsel %vm474_vm0, %v424_v45, %v454_v48  ;;  %v605_v8 = vld [vmem:[#allocation10] sm:$0xff]  ;;  %v515_v16 = vld [vmem:[#allocation9 + $0xd0] sm:$0xff]  ;;  %s821_s28 = scalar_lea.hbm %s1733_s9, %s986_s16  ;;  %s823_s13 = sshll.u32 %s412_s3, 4  ;;  %s824_s13 = int_to_ptr.vmem [resolvable:$true] %s823_s13 }
  0x55   : > { %554 = vmatpush.msra.mxu0 %v507_v27  ;;  %573 = vmatpush.msra.mxu1 %v511_v31  ;;  %v448_v47 = vld [vmem:[%s447_s30] sm:$0x1]  ;;  %v466_v58 = vrot.slane %v444_v46, 3  ;;  %v477_v62 = vsel %vm476_vm1, %v475_v59, %v457_v49  ;;  %v493_v13 = vld [vmem:[#allocation9 + $0x20] sm:$0xff]  ;;  %v490_v17 = vld [vmem:[#allocation9 + $0x8] sm:$0xff]  ;;  %s825_s30 = sshll.u32 %s821_s28, 4  ;;  %s826_s30 = int_to_ptr.hbm [resolvable:$true] %s825_s30 }
  0x56   : > { %670 = vmatpush.msra.mxu3 %v623_v28  ;;  %v452_v53 = vld [vmem:[%s451_s29] sm:$0x1]  ;;  %v469_v61 = vrot.slane %v448_v47, 2  ;;  %v479_v3 = vsel %vm478_vm2, %v477_v62, %v460_v50  ;;  %v645_v18 = vld [vmem:[#allocation10 + $0x140] sm:$0xff]  ;;  %v642_v21 = vld [vmem:[#allocation10 + $0x128] sm:$0xff]  ;;  %s811_s29 = scalar_lea.sflag [#allocation6], %s410_s1 }
  0x57   : > { %555 = vmatpush.msra.mxu0 %v504_v30  ;;  %574 = vmatpush.msra.mxu1 %v508_v36  ;;  %v524_v55 = vld [vmem:[#allocation9 + $0x118] sm:$0xff]  ;;  %v472_v2 = vrot.slane %v452_v53, 1  ;;  %v481_v5 = vsel %vm480_vm3, %v479_v3, %v463_v54  ;;  %v649_v22 = vld [vmem:[#allocation10 + $0x160] sm:$0xff]  ;;  %v639_v24 = vld [vmem:[#allocation10 + $0x110] sm:$0xff]  ;;  %s1348_s14 = sshra.s32 %s826_s30, 4  ;;  %s1349_s14 = int_to_ptr.hbm [resolvable:$true] %s1348_s14 }
  0x58   : > { %671 = vmatpush.msra.mxu3 %v620_v34  ;;  %v492_v0 = vld [vmem:[#allocation9 + $0x18] sm:$0xff]  ;;  %589 = vmatpush.msra.mxu2 %v524_v55  ;;  %v483_v9 = vsel %vm482_vm4, %v481_v5, %v466_v58  ;;  %v509_v23 = vld [vmem:[#allocation9 + $0xa0] sm:$0xff]  ;;  %v646_v25 = vld [vmem:[#allocation10 + $0x148] sm:$0xff]  ;;  %s1350_s21 = scalar_lea.hbm %s1349_s14, 8  ;;  %p1355_p4 = scmp.lt.s32.totalorder %s1349_s14, %s1733_s9 }
  0x59   : > { %556 = vmatpush.msra.mxu0 %v501_v33  ;;  %575 = vmatpush.msra.mxu1 %v505_v44  ;;  %v608_v1 = vld [vmem:[#allocation10 + $0x18] sm:$0xff]  ;;  %v485_v12 = vsel %vm484_vm5, %v483_v9, %v469_v61  ;;  %v506_v26 = vld [vmem:[#allocation9 + $0x88] sm:$0xff]  ;;  %v643_v28 = vld [vmem:[#allocation10 + $0x130] sm:$0xff]  ;;  %p1351_p0 = scmp.ne.s32.totalorder %s1349_s14, %s1350_s21  ;;  %p1356_p7 = scmp.lt.s32.totalorder %s1354_s19, %s1350_s21 }
  0x5a   : > { %672 = vmatpush.msra.mxu3 %v617_v35  ;;  %v496_v4 = vld [vmem:[#allocation9 + $0x38] sm:$0xff]  ;;  %590 = vmatpush.msra.mxu2 %v521_v63  ;;  %v1653_v14 = vsel %vm486_vm6, %v485_v12, %v472_v2  ;;  %v503_v29 = vld [vmem:[#allocation9 + $0x70] sm:$0xff]  ;;  %v633_v30 = vld [vmem:[#allocation10 + $0xe0] sm:$0xff] }
  0x5b   : > { %557 = vmatpush.msra.mxu0 %v498_v39  ;;  %576 = vmatpush.msra.mxu1 %v502_v52  ;;  %v1650_v11 = vld [vmem:[#allocation16] sm:$0xff]  ;;  %v630_v33 = vld [vmem:[#allocation10 + $0xc8] sm:$0xff]  ;;  %v637_v34 = vld [vmem:[#allocation10 + $0x100] sm:$0xff]  ;;  %p1352_p1 = pnand %p1351_p0, %p1530_p5  ;;  %p1357_p8 = por %p1356_p7, %p1355_p4 }
  0x5c   : > { %673 = vmatpush.msra.mxu3 %v614_v40  ;;  %591 = vmatpush.msra.mxu2 %v518_v6  ;;  %v648_v15 = vld [vmem:[#allocation10 + $0x158] sm:$0xff]  ;;  %v497_v35 = vld [vmem:[#allocation9 + $0x40] sm:$0xff]  ;;  %v627_v36 = vld [vmem:[#allocation10 + $0xb0] sm:$0xff] }
  0x5d   : > { %558 = vmatpush.msra.mxu0 %v495_v56  ;;  %577 = vmatpush.msra.mxu1 %v499_v60  ;;  %v652_v19 = vld [vmem:[#allocation10 + $0x178] sm:$0xff]  ;;  %v634_v37 = vld [vmem:[#allocation10 + $0xe8] sm:$0xff]  ;;  %v631_v40 = vld [vmem:[#allocation10 + $0xd0] sm:$0xff]  ;;  %p1353_p3 = pneg %p1352_p1 }
  0x5e   : > { %674 = vmatpush.msra.mxu3 %v611_v57  ;;  %592 = vmatpush.msra.mxu2 %v515_v16  ;;  %v512_v20 = vld [vmem:[#allocation9 + $0xb8] sm:$0xff]  ;;  %v494_v38 = vld [vmem:[#allocation9 + $0x28] sm:$0xff]  ;;  %v491_v41 = vld [vmem:[#allocation9 + $0x10] sm:$0xff] }
  0x5f   : > { %559 = vmatpush.msra.mxu0 %v492_v0  ;;  %578 = vmatpush.msra.mxu1 %v496_v4  ;;  %v636_v27 = vld [vmem:[#allocation10 + $0xf8] sm:$0xff]  ;;  %v621_v42 = vld [vmem:[#allocation10 + $0x80] sm:$0xff]  ;;  %v618_v44 = vld [vmem:[#allocation10 + $0x68] sm:$0xff]  ;;  %p1358_p9 = pnand %p1357_p8, %p1353_p3 }
  0x60   : > { %675 = vmatpush.msra.mxu3 %v608_v1  ;;  %593 = vmatpush.msra.mxu2 %v512_v20  ;;  %v640_v31 = vld [vmem:[#allocation10 + $0x118] sm:$0xff]  ;;  %v625_v45 = vld [vmem:[#allocation10 + $0xa0] sm:$0xff]  ;;  %v615_v46 = vld [vmem:[#allocation10 + $0x50] sm:$0xff] }
  0x61   : > { %560 = vmatpush.msra.mxu0 %v489_v7  ;;  %579 = vmatpush.msra.mxu1 %v493_v13  ;;  %v500_v32 = vld [vmem:[#allocation9 + $0x58] sm:$0xff]  ;;  %v622_v47 = vld [vmem:[#allocation10 + $0x88] sm:$0xff]  ;;  %v619_v49 = vld [vmem:[#allocation10 + $0x70] sm:$0xff] }
  0x62   : > { %676 = vmatpush.msra.mxu3 %v605_v8  ;;  %561 = vmatmul.f32.vlgmr.msra.gmra.mxu0 %v1653_v14  ;;  %v624_v39 = vld [vmem:[#allocation10 + $0x98] sm:$0xff]  ;;  %v609_v50 = vld [vmem:[#allocation10 + $0x20] sm:$0xff]  ;;  %v606_v52 = vld [vmem:[#allocation10 + $0x8] sm:$0xff] }
  0x63   : > { %681 = vmatpush.msrb.mxu0 %v651_v10  ;;  %677 = vmatmul.f32.vlgmr.msra.gmra.mxu3 %v1650_v11  ;;  %v628_v43 = vld [vmem:[#allocation10 + $0xb8] sm:$0xff]  ;;  %v613_v53 = vld [vmem:[#allocation10 + $0x40] sm:$0xff]  ;;  %v610_v54 = vld [vmem:[#allocation10 + $0x28] sm:$0xff] }
  0x64   : > { %580 = vmatpush.msra.mxu1 %v490_v17  ;;  %594 = vmatpush.msra.mxu2 %v509_v23  ;;  %v612_v48 = vld [vmem:[#allocation10 + $0x38] sm:$0xff]  ;;  %v607_v55 = vld [vmem:[#allocation10 + $0x10] sm:$0xff]  ;;  %v1666_v57 = vld [vmem:[#allocation12] sm:$0x7] }
  0x65   : > { %682 = vmatpush.msrb.mxu0 %v648_v15  ;;  %581 = vmatmul.f32.vlgmr.msra.gmra.mxu1 %v1653_v14  ;;  %v616_v51 = vld [vmem:[#allocation10 + $0x58] sm:$0xff]  ;;  %v655_v60 = vperm.slane %v1666_v57, 0  ;;  %v782_v3 = vld [vmem:[#allocation13 + $0x68] sm:$0xff]  ;;  %v781_v5 = vld [vmem:[#allocation13 + $0x60] sm:$0xff]  ;;  %v656_v20 = vperm.slane %v1666_v57, 1 }
  0x66   : > { %701 = vmatpush.msrb.mxu1 %v652_v19  ;;  %595 = vmatpush.msra.mxu2 %v506_v26  ;;  %v1664_v56 = vld [vmem:[%s1729_s5] sm:$0x7]  ;;  %v784_v63 = vld [vmem:[#allocation13 + $0x78] sm:$0xff]  ;;  %v778_v8 = vld [vmem:[#allocation13 + $0x48] sm:$0xff] }
  0x67   : > { %683 = vmatpush.msrb.mxu0 %v645_v18  ;;  %v539_v58 = vperm.slane %v1664_v56, 0  ;;  %v783_v1 = vld [vmem:[#allocation13 + $0x70] sm:$0xff]  ;;  %v780_v6 = vld [vmem:[#allocation13 + $0x58] sm:$0xff]  ;;  %v777_v12 = vld [vmem:[#allocation13 + $0x40] sm:$0xff]  ;;  %v540_v16 = vperm.slane %v1664_v56, 1 }
  0x68   : > { %702 = vmatpush.msrb.mxu1 %v649_v22  ;;  %596 = vmatpush.msra.mxu2 %v503_v29  ;;  %v779_v7 = vld [vmem:[#allocation13 + $0x50] sm:$0xff]  ;;  %v776_v13 = vld [vmem:[#allocation13 + $0x38] sm:$0xff]  ;;  %v774_v15 = vld [vmem:[#allocation13 + $0x28] sm:$0xff] }
  0x69   : > { %684 = vmatpush.msrb.mxu0 %v642_v21  ;;  %v773_v17 = vld [vmem:[#allocation13 + $0x20] sm:$0xff]  ;;  %v772_v21 = vld [vmem:[#allocation13 + $0x18] sm:$0xff] }
  0x6a   : > { %703 = vmatpush.msrb.mxu1 %v646_v25  ;;  %597 = vmatpush.msra.mxu2 %v500_v32 }
  0x6b   : > { %685 = vmatpush.msrb.mxu0 %v639_v24  ;;  %v771_v24 = vld [vmem:[#allocation13 + $0x10] sm:$0xff] }
  0x6c   : > { %704 = vmatpush.msrb.mxu1 %v643_v28  ;;  %598 = vmatpush.msra.mxu2 %v497_v35 }
  0x6d   : > { %686 = vmatpush.msrb.mxu0 %v636_v27  ;;  %v770_v27 = vld [vmem:[#allocation13 + $0x8] sm:$0xff] }
  0x6e   : > { %705 = vmatpush.msrb.mxu1 %v640_v31  ;;  %599 = vmatpush.msra.mxu2 %v494_v38 }
  0x6f   : > { %687 = vmatpush.msrb.mxu0 %v633_v30  ;;  %v769_v30 = vld [vmem:[#allocation13] sm:$0xff] }
  0x70   : > { %706 = vmatpush.msrb.mxu1 %v637_v34  ;;  %600 = vmatpush.msra.mxu2 %v491_v41 }
  0x71   : > { %688 = vmatpush.msrb.mxu0 %v630_v33  ;;  %601 = vmatmul.f32.vlgmr.msra.gmra.mxu2 %v1653_v14  ;;  %v775_v14 = vld [vmem:[#allocation13 + $0x30] sm:$0xff] }
  0x72   : > { %707 = vmatpush.msrb.mxu1 %v634_v37  ;;  %789 = vmatpush.msrb.mxu2 %v784_v63 }
  0x73   : > { %689 = vmatpush.msrb.mxu0 %v627_v36  ;;  %v657_v36 = vperm.slane %v1666_v57, 2 }
  0x74   : > { %708 = vmatpush.msrb.mxu1 %v631_v40  ;;  %790 = vmatpush.msrb.mxu2 %v783_v1 }
  0x75   : > { %690 = vmatpush.msrb.mxu0 %v624_v39 }
  0x76   : > { %709 = vmatpush.msrb.mxu1 %v628_v43  ;;  %791 = vmatpush.msrb.mxu2 %v782_v3  ;;  %v541_v43 = vperm.slane %v1664_v56, 2 }
  0x77   : > { %691 = vmatpush.msrb.mxu0 %v621_v42 }
  0x78   : > { %710 = vmatpush.msrb.mxu1 %v625_v45  ;;  %792 = vmatpush.msrb.mxu2 %v781_v5 }
  0x79   : > { %692 = vmatpush.msrb.mxu0 %v618_v44 }
  0x7a   : > { %711 = vmatpush.msrb.mxu1 %v622_v47  ;;  %793 = vmatpush.msrb.mxu2 %v780_v6 }
  0x7b   : > { %693 = vmatpush.msrb.mxu0 %v615_v46 }
  0x7c   : > { %712 = vmatpush.msrb.mxu1 %v619_v49  ;;  %794 = vmatpush.msrb.mxu2 %v779_v7 }
  0x7d   : > { %694 = vmatpush.msrb.mxu0 %v612_v48 }
  0x7e   : > { %713 = vmatpush.msrb.mxu1 %v616_v51  ;;  %795 = vmatpush.msrb.mxu2 %v778_v8 }
  0x7f   : > { %695 = vmatpush.msrb.mxu0 %v609_v50 }
  0x80   : > { %714 = vmatpush.msrb.mxu1 %v613_v53  ;;  %796 = vmatpush.msrb.mxu2 %v777_v12 }
  0x81   : > { %696 = vmatpush.msrb.mxu0 %v606_v52 }
  0x82   : > { %697 = vmatmul.f32.vlgmr.msrb.gmra.mxu0 %v1650_v11  ;;  %715 = vmatpush.msrb.mxu1 %v610_v54 }
  0x83   : > { %797 = vmatpush.msrb.mxu2 %v776_v13 }
  0x84   : > { %716 = vmatpush.msrb.mxu1 %v607_v55 }
  0x85   : > { %717 = vmatmul.f32.vlgmr.msrb.gmra.mxu1 %v1650_v11  ;;  %798 = vmatpush.msrb.mxu2 %v775_v14 }
  0x87   : > { %799 = vmatpush.msrb.mxu2 %v774_v15 }
  0x89   : > { %800 = vmatpush.msrb.mxu2 %v773_v17 }
  0x8b   : > { %801 = vmatpush.msrb.mxu2 %v772_v21 }
  0x8d   : > { %802 = vmatpush.msrb.mxu2 %v771_v24 }
  0x8f   : > { %803 = vmatpush.msrb.mxu2 %v770_v27 }
  0x91   : > { %804 = vmatpush.msrb.mxu2 %v769_v30 }
  0xdf   : > { %v562_v59 = vpop.f32.mrf.mxu0 }
  0xe0   : > { %v563_v61 = vadd.f32 %v562_v59, %v539_v58 }
  0xe2   : > { %v582_v18 = vpop.f32.mrf.mxu1 }
  0xe3   : > { %v583_v23 = vadd.f32 %v582_v18, %v540_v16 }
  0xe6   : > { %v678_v62 = vpop.f32.mrf.mxu3 }
  0xe7   : > { %v679_v0 = vadd.f32 %v678_v62, %v655_v60 }
  0xe9   : > { %v721_v2 = vadd.f32 %v679_v0, %v563_v61 }
  0xeb   : > { %v983_v4 = vmul.f32 -1.442695, %v721_v2 }
  0xed   : > { %1104 = vpow2.f32 %v983_v4 }
  0xf3   : > { %v1105_v9 = vpop.eup %1104 }
  0xf4   : > { %v725_v10 = vadd.f32 1.0, %v1105_v9  ;;  %v602_v45 = vpop.f32.mrf.mxu2 }
  0xf5   : > { %v603_v47 = vadd.f32 %v602_v45, %v541_v43 }
  0xf6   : > { %1106 = vrcp.f32 %v725_v10  ;;  %vm731_vm7 = vweird.f32 %v725_v10  ;;  %v737_v33 = vand.u32 2147483648, %v725_v10  ;;  %v735_v35 = vand.u32 2147483647, %v725_v10 }
  0xf8   : > { %v738_v39 = vor.u32 1.1754944e-38, %v737_v33  ;;  %vm736_vm10 = vcmp.eq.f32.partialorder %v735_v35, 8.507059e+37 }
  0xfc   : > { %v1107_v19 = vpop.eup %1106 }
  0xfd   : > { %v727_v22 = vmul.f32 %v1107_v19, %v725_v10  ;;  %vm732_vm8 = vweird.f32 %v1107_v19 }
  0xfe   : > { %vm733_vm9 = vmor %vm731_vm7, %vm732_vm8 }
  0xff   : > { %v698_v25 = vpop.f32.mrf.mxu0  ;;  %v728_v28 = vsub.f32 1.0, %v727_v22 }
 0x100   : > { %v699_v26 = vadd.f32 %v698_v25, %v656_v20 }
 0x101   : > { %v729_v32 = vmul.f32 %v1107_v19, %v728_v28 }
 0x102   : > { %v741_v29 = vadd.f32 %v699_v26, %v583_v23  ;;  %v718_v38 = vpop.f32.mrf.mxu1 }
 0x103   : > { %v730_v34 = vadd.f32 %v1107_v19, %v729_v32  ;;  %v719_v42 = vadd.f32 %v718_v38, %v657_v36 }
 0x104   : > { %v984_v31 = vmul.f32 -1.442695, %v741_v29 }
 0x105   : > { %v734_v41 = vsel %vm733_vm9, %v1107_v19, %v730_v34 }
 0x106   : > { %1108 = vpow2.f32 %v984_v31  ;;  %v739_v44 = vsel %vm736_vm10, %v738_v39, %v734_v41 }
 0x107   : > { %v761_v46 = vmul.f32 %v739_v44, %v719_v42 }
 0x109   : > { %v762_v50 = vadd.f32 %v761_v46, %v603_v47 }
 0x10c   : > { %v1109_v37 = vpop.eup %1108 }
 0x10d   : > { %v745_v40 = vadd.f32 1.0, %v1109_v37 }
 0x10f   : > { %1110 = vrcp.f32 %v745_v40  ;;  %v757_v52 = vand.u32 2147483648, %v745_v40  ;;  %v755_v54 = vand.u32 2147483647, %v745_v40  ;;  %vm751_vm12 = vweird.f32 %v745_v40 }
 0x110   : > { %1112 = vtanh.f32 %v762_v50 }
 0x111   : > { %v758_v57 = vor.u32 1.1754944e-38, %v757_v52  ;;  %vm756_vm14 = vcmp.eq.f32.partialorder %v755_v54, 8.507059e+37 }
 0x115   : > { %v1111_v48 = vpop.eup %1110 }
 0x116   : > { %v747_v49 = vmul.f32 %v1111_v48, %v745_v40  ;;  %vm752_vm11 = vweird.f32 %v1111_v48  ;;  %v1113_v60 = vpop.eup %1112 }
 0x117   : > { %vm753_vm13 = vmor %vm751_vm12, %vm752_vm11 }
 0x118   : > { %v748_v51 = vsub.f32 1.0, %v747_v49 }
 0x11a   : > { %v749_v53 = vmul.f32 %v1111_v48, %v748_v51 }
 0x11c   : > { %v750_v55 = vadd.f32 %v1111_v48, %v749_v53 }
 0x11e   : > { %v754_v58 = vsel %vm753_vm13, %v1111_v48, %v750_v55 }
 0x11f   : > { %v759_v56 = vsel %vm756_vm14, %v758_v57, %v754_v58 }
 0x120   : > { %v764_v59 = vsub.f32 1.0, %v759_v56  ;;  %v766_v62 = vmul.f32 %v759_v56, %v1650_v11  ;;  %v1103_v11 = vld [vmem:[%s1732_s8] ss:$0 sm:$0xff] }
 0x122   : > { %v765_v61 = vmul.f32 %v1113_v60, %v764_v59 }
 0x124   : > { %v767_v63 = vadd.f32 %v766_v62, %v765_v61 }
 0x126   : > { %805 = vmatmul.f32.vlgmr.msrb.gmra.mxu2 %v767_v63  ;;  %768 = vst [vmem:[#allocation16] sm:$0xff] %v767_v63 }
 0x127   : > { %1017 = dma.vmem_to_hbm [thread:$0]  (%p223_p2), %s836_s4, 128, %s838_s12, [#allocation17]  }
 0x1a9   : > { %v806_v0 = vpop.f32.mrf.mxu2 }
 0x1aa   : > { %v807_v1 = vadd.f32 %v1103_v11, %v806_v0 }
 0x1ac   : > { %809 = vst [vmem:[%s412_s3] sm:$0xff] %v807_v1 }
 0x1ad   : > { %1361 = shalt.err (!%p1358_p9)
}
 0x1ae   : > { %1015 = dma.vmem_to_hbm [thread:$0]  (%p1530_p5), %s824_s13, 128, %s826_s30, %s811_s29  }
 0x1af   : > { %1397 = dma.done.wait (%p223_p2), [#allocation17], 128  }
 0x1b0   : > { %1399 = vsyncadd (%p223_p2), [#allocation17], 4294967168 }
 0x1b1 PF: > { %p1058_p10 = scmp.ge.s32.totalorder %s1418_s0, 2  ;;  %s854_s1 = sand.u32 1, %s1406_s17  }
 0x1b2   : > { %s855_s2 = scalar_lea.sflag [#allocation6], %s854_s1 }
 0x1b3   : > { %p1041_p11 = pnand %p1058_p10, %p1534_p6 }
 0x1b5   : > { %p1042_p12 = pneg %p1041_p11 }
 0x1b7   : > { %1401 = dma.done.wait (%p1042_p12), %s855_s2, 128  }
 0x1b8   : > { %1403 = vsyncadd (%p1042_p12), %s855_s2, 4294967168  ;;  %s1753_s0 = sld [smem:[#allocation26_spill]]  ;;  %s1756_s17 = smov %s1410_s18 }
 0x1b9   : > { %s1754_s26 = sld [smem:[#allocation25_spill]] }
 0x1ba   : > { %s1755_s19 = sld [smem:[#allocation27_spill]] }
 0x1be   : > { %p34_p5 = scmp.ge.s32.totalorder %s1753_s0, 10  }
 0x1bf   : > { %s1757_s18 = smov %s1754_s26 }
 0x1c0   :  { %36 = sbr.rel (!%p34_p5) target bundleno = 17 (0x11), region = 129 }
 0x1c5   :  { %861 = vsyncpa [#allocation5], 1 }
 0x1c6   :  { %863 = vsyncpa [#allocation5 + $0x1], 1 }
 0x1c7   :  { %864 = vsyncpa [#allocation8], 1 }
 0x1c8   :  { %865 = vsyncpa [#allocation11], 1 }
 0x1c9   :  { %866 = vsyncpa [#allocation14], 1 }
 0x1ca   :  { %867 = vsyncpa [#allocation6], 1 }
 0x1cb   :  { %869 = vsyncpa [#allocation6 + $0x1], 1 }
 0x1cc   :  { %870 = vsyncpa [#allocation17], 1 }

</bundles_post_ra>
